<compile_context>
chip_gen: v7x
topology: tpu7x:2x2x1
jax: 0.10.0
libtpu: 0.0.40
codegen_flags: <defaults>
</compile_context>

<pallas_src>
import functools

import jax
import jax.numpy as jnp
from jax.experimental import pallas as pl
from jax.experimental.pallas import tpu as pltpu

_LANE = 128   # lane (last-dim) padding target
_SUB = 16     # sublane padding target (bf16-friendly)


def _round_up(x, m):
    return ((x + m - 1) // m) * m


@functools.lru_cache(maxsize=None)
def _vmem_limits():
    """Generation-aware VMEM sizing -> (tile-picker budget, scoped-vmem limit)."""
    cap = None
    try:
        cap = getattr(pltpu.get_tpu_info(), "vmem_capacity_bytes", None)
    except Exception:
        cap = None
    if not cap:
        cap = 64 * 1024 * 1024          # conservative fallback (v7x per-core)
    limit = min(int(cap * 3 // 4), cap - 8 * 1024 * 1024)
    limit = max(limit, 16 * 1024 * 1024)
    budget = limit // 2
    return int(budget), int(limit)


def _working_set_bytes(tm, ks, cp):
    """Resident VMEM estimate for one pass whose matmuls have padded K dims `ks`."""
    b = 0
    for k in ks:
        b += 2 * tm * k * 2            # bf16 patch tile, double-buffered
        b += 2 * k * cp * 2            # bf16 weight block (counted double-buffered)
    b += 2 * tm * cp * 2               # bf16 conv-out tile, double-buffered
    b += 2 * tm * cp * 4               # f32 accumulator / f32 epilogue-out headroom
    b += len(ks) * 2 * 2 * cp * 4      # per-tile stats blocks
    return b


def _pick_tile_m(m, k_lists, cp):
    """Largest power-of-two row tile whose working set (for every pass) fits
    the generation-specific VMEM budget, with a >=2-tile guarantee so both
    v7x TensorCores get grid steps."""
    budget, _ = _vmem_limits()
    m16 = _round_up(m, _SUB)
    tm = 2048
    while tm > 64 and any(_working_set_bytes(tm, ks, cp) > budget
                          for ks in k_lists):
        tm //= 2
    tm = min(tm, m16)
    tm = max(_SUB, (tm // _SUB) * _SUB)
    # v7x megacore: the 1-D "parallel" grid is how work is split across the two
    # TensorCores; if everything fits in one tile, split it in two.
    if tm == m16 and tm >= 128 and (tm // 2) % _SUB == 0:
        tm //= 2
    return tm


def _pad2(a, rows, cols):
    return jnp.pad(a, ((0, rows - a.shape[0]), (0, cols - a.shape[1])))


# ----------------------------------------------------------------------------
# Pass 1: conv (im2col matmul, MXU) + per-tile partial BN statistics
# ----------------------------------------------------------------------------
def _make_conv_stats_kernel(has_second):
    def kernel(*refs):
        if has_second:
            x_ref, w_ref, x2_ref, w2_ref, y_ref, s_ref, s2_ref = refs
        else:
            x_ref, w_ref, y_ref, s_ref = refs

        acc = jnp.dot(x_ref[...], w_ref[...],
                      preferred_element_type=jnp.float32)
        # bf16 conv output: halves HBM write (pass 1) + read (pass 2) traffic;
        # BN statistics remain exact, computed from the f32 accumulator.
        y_ref[...] = acc.astype(y_ref.dtype)
        s_ref[:, 0:1, :] = jnp.sum(acc, axis=0, keepdims=True)[None]
        s_ref[:, 1:2, :] = jnp.sum(acc * acc, axis=0, keepdims=True)[None]

        if has_second:
            acc2 = jnp.dot(x2_ref[...], w2_ref[...],
                           preferred_element_type=jnp.float32)
            s2_ref[:, 0:1, :] = jnp.sum(acc2, axis=0, keepdims=True)[None]
            s2_ref[:, 1:2, :] = jnp.sum(acc2 * acc2, axis=0, keepdims=True)[None]

    return kernel


def conv_stats(patches, w, patches2=None, w2=None, *, tm):
    """patches: [Mp, Kp] bf16, w: [Kp, Cp] bf16 (both padded).  Optional second
    (1x1 shortcut) matmul shares the M grid so its BN stats come for free."""
    mp, kp = patches.shape
    cp = w.shape[1]
    n_tiles = mp // tm
    has2 = patches2 is not None
    _, vmem_limit = _vmem_limits()

    args = [patches, w]
    in_specs = [
        pl.BlockSpec((tm, kp), lambda i: (i, 0)),
        pl.BlockSpec((kp, cp), lambda i: (0, 0)),
    ]
    out_shape = [
        jax.ShapeDtypeStruct((mp, cp), jnp.bfloat16),          # bf16 intermediate
        jax.ShapeDtypeStruct((n_tiles, 2, cp), jnp.float32),   # per-tile (sum, sumsq)
    ]
    out_specs = [
        pl.BlockSpec((tm, cp), lambda i: (i, 0)),
        pl.BlockSpec((1, 2, cp), lambda i: (i, 0, 0)),
    ]
    flops = 2 * mp * kp * cp
    bytes_acc = (patches.size * 2 + w.size * 2 + mp * cp * 2
                 + n_tiles * 2 * cp * 4)

    if has2:
        k2 = patches2.shape[1]
        args += [patches2, w2]
        in_specs += [
            pl.BlockSpec((tm, k2), lambda i: (i, 0)),
            pl.BlockSpec((k2, cp), lambda i: (0, 0)),
        ]
        out_shape.append(jax.ShapeDtypeStruct((n_tiles, 2, cp), jnp.float32))
        out_specs.append(pl.BlockSpec((1, 2, cp), lambda i: (i, 0, 0)))
        flops += 2 * mp * k2 * cp
        bytes_acc += patches2.size * 2 + w2.size * 2 + n_tiles * 2 * cp * 4

    return pl.pallas_call(
        _make_conv_stats_kernel(has2),
        out_shape=tuple(out_shape),
        grid=(n_tiles,),
        in_specs=in_specs,
        out_specs=tuple(out_specs),
        compiler_params=pltpu.CompilerParams(
            dimension_semantics=("parallel",),
            vmem_limit_bytes=vmem_limit,
        ),
        cost_estimate=pl.CostEstimate(
            flops=flops, transcendentals=0, bytes_accessed=bytes_acc),
    )(*args)


# ----------------------------------------------------------------------------
# Pass 2: normalize (scale/shift) [+ fused 1x1-conv-BN shortcut] + ReLU
# ----------------------------------------------------------------------------
def _make_bn_act_kernel(has_res):
    def kernel(*refs):
        if has_res:
            y_ref, sc_ref, sh_ref, p_ref, wr_ref, scr_ref, shr_ref, o_ref = refs
        else:
            y_ref, sc_ref, sh_ref, o_ref = refs
        out = y_ref[...].astype(jnp.float32) * sc_ref[...] + sh_ref[...]
        if has_res:
            r = jnp.dot(p_ref[...], wr_ref[...],
                        preferred_element_type=jnp.float32)
            out = out + (r * scr_ref[...] + shr_ref[...])
        o_ref[...] = jnp.maximum(out, 0.0).astype(o_ref.dtype)

    return kernel


def bn_act(y, scale, shift, res_patches=None, res_w=None, res_scale=None,
           res_shift=None, *, tm, out_dtype):
    mp, cp = y.shape
    n_tiles = mp // tm
    has_res = res_patches is not None
    _, vmem_limit = _vmem_limits()

    args = [y, scale, shift]
    in_specs = [
        pl.BlockSpec((tm, cp), lambda i: (i, 0)),
        pl.BlockSpec((1, cp), lambda i: (0, 0)),
        pl.BlockSpec((1, cp), lambda i: (0, 0)),
    ]
    flops = 2 * mp * cp
    bytes_acc = (y.size * jnp.dtype(y.dtype).itemsize
                 + mp * cp * jnp.dtype(out_dtype).itemsize)
    if has_res:
        kr = res_patches.shape[1]
        args += [res_patches, res_w, res_scale, res_shift]
        in_specs += [
            pl.BlockSpec((tm, kr), lambda i: (i, 0)),
            pl.BlockSpec((kr, cp), lambda i: (0, 0)),
            pl.BlockSpec((1, cp), lambda i: (0, 0)),
            pl.BlockSpec((1, cp), lambda i: (0, 0)),
        ]
        flops += 2 * mp * kr * cp
        bytes_acc += res_patches.size * 2 + res_w.size * 2

    return pl.pallas_call(
        _make_bn_act_kernel(has_res),
        out_shape=jax.ShapeDtypeStruct((mp, cp), out_dtype),
        grid=(n_tiles,),
        in_specs=in_specs,
        out_specs=pl.BlockSpec((tm, cp), lambda i: (i, 0)),
        compiler_params=pltpu.CompilerParams(
            dimension_semantics=("parallel",),
            vmem_limit_bytes=vmem_limit,
        ),
        cost_estimate=pl.CostEstimate(
            flops=flops, transcendentals=0, bytes_accessed=bytes_acc),
    )(*args)


# ----------------------------------------------------------------------------
# Tiny per-channel finalize: partial (sum, sumsq) -> BN scale/shift (JAX glue)
# ----------------------------------------------------------------------------
def bn_affine(partial_stats, m_real, gamma, beta, c_pad, eps):
    s = jnp.sum(partial_stats.astype(jnp.float32), axis=0)      # [2, Cp]
    mean = s[0] / m_real
    var = jnp.maximum(s[1] / m_real - mean * mean, 0.0)          # biased, clamped
    g = jnp.pad(gamma.astype(jnp.float32), (0, c_pad - gamma.shape[0]))
    b = jnp.pad(beta.astype(jnp.float32), (0, c_pad - beta.shape[0]))
    scale = g * jax.lax.rsqrt(var + eps)
    shift = b - mean * scale
    return scale.reshape(1, c_pad), shift.reshape(1, c_pad)


# ----------------------------------------------------------------------------
# Glue: layout transforms (NCHW->NHWC, im2col) in plain JAX
# ----------------------------------------------------------------------------
def im2col(x_nhwc, ksize, stride, padding):
    n, h, w, c = x_nhwc.shape
    xp = jnp.pad(x_nhwc, ((0, 0), (padding, padding), (padding, padding), (0, 0)))
    ho = (h + 2 * padding - ksize) // stride + 1
    wo = (w + 2 * padding - ksize) // stride + 1
    cols = []
    for kh in range(ksize):
        for kw in range(ksize):
            patch = xp[:, kh:kh + stride * (ho - 1) + 1:stride,
                          kw:kw + stride * (wo - 1) + 1:stride, :]
            cols.append(patch)
    patches = jnp.concatenate(cols, axis=-1)          # [N, Ho, Wo, k*k*C]
    return patches.reshape(n * ho * wo, ksize * ksize * c), (n, ho, wo)


def resblock_forward(x_nchw, params, stride, padding, eps=1e-5,
                     out_dtype=jnp.float32):
    x = jnp.transpose(x_nchw, (0, 2, 3, 1)).astype(jnp.float32)  # NCHW -> NHWC
    cin = x.shape[-1]
    cout = params["g1"].shape[0]
    # Keep Cp=128-padded (matches v5e's 128x128 MXUs; memory-bound passes on
    # v6e/v7x don't benefit from 256-wide padding while im2col remains in HBM).
    cp = _round_up(cout, _LANE)
    has_res = params.get("w_res") is not None

    # ---- tile size shared by all passes (full working-set, per-generation) ----
    k1p = _round_up(9 * cin, _LANE)
    k2p = _round_up(9 * cout, _LANE)
    krp = _round_up(cin, _LANE)
    k_lists = [[k1p], [k2p, krp] if has_res else [k2p]]

    # ---- conv_1 (3x3, stride) -> bn_1 -> relu ----
    p1, (n, ho, wo) = im2col(x, 3, stride, padding)
    m = p1.shape[0]
    tm = _pick_tile_m(m, k_lists, cp)
    mp = _round_up(m, tm)

    p1p = _pad2(p1, mp, k1p).astype(jnp.bfloat16)
    w1p = _pad2(params["w1"].astype(jnp.float32), k1p, cp).astype(jnp.bfloat16)
    y1, st1 = conv_stats(p1p, w1p, tm=tm)
    sc1, sh1 = bn_affine(st1, m, params["g1"], params["b1"], cp, eps)
    a1 = bn_act(y1, sc1, sh1, tm=tm, out_dtype=jnp.bfloat16)     # relu'd, bf16

    # ---- conv_2 (3x3, stride 1, pad 1) -> bn_2 -> (+shortcut) -> relu ----
    a1_nhwc = a1[:m, :cout].reshape(n, ho, wo, cout)
    p2, _ = im2col(a1_nhwc, 3, 1, 1)
    p2p = _pad2(p2, mp, k2p).astype(jnp.bfloat16)
    w2p = _pad2(params["w2"].astype(jnp.float32), k2p, cp).astype(jnp.bfloat16)

    if has_res:
        # 1x1-conv + BN shortcut, fused: its BN statistics ride along with
        # conv_2's matmul pass; the cheap 1x1 matmul is recomputed in the
        # normalize pass instead of round-tripping an [M, Cout] residual.
        pr, _ = im2col(x, 1, stride, 0)
        assert pr.shape[0] == m
        prp = _pad2(pr, mp, krp).astype(jnp.bfloat16)
        wrp = _pad2(params["w_res"].astype(jnp.float32), krp, cp
                    ).astype(jnp.bfloat16)

        y2, st2, str_ = conv_stats(p2p, w2p, prp, wrp, tm=tm)
        sc2, sh2 = bn_affine(st2, m, params["g2"], params["b2"], cp, eps)
        scr, shr = bn_affine(str_, m, params["g_res"], params["b_res"], cp, eps)
        out = bn_act(y2, sc2, sh2, prp, wrp, scr, shr, tm=tm,
                     out_dtype=out_dtype)
    else:
        # Matches the PyTorch module exactly: when res_con is None (i.e. NOT
        # (stride != 1 and cin != cout)) there is NO identity skip connection.
        y2, st2 = conv_stats(p2p, w2p, tm=tm)
        sc2, sh2 = bn_affine(st2, m, params["g2"], params["b2"], cp, eps)
        out = bn_act(y2, sc2, sh2, tm=tm, out_dtype=out_dtype)

    out_nhwc = out[:m, :cout].reshape(n, ho, wo, cout)
    return jnp.transpose(out_nhwc, (0, 3, 1, 2))                 # NHWC -> NCHW


# ----------------------------------------------------------------------------
# Deterministic parameter init (synthetic; shapes follow nn.Module __init__)
# ----------------------------------------------------------------------------
def init_params(key, in_channels, out_channels, stride):
    ks = jax.random.split(key, 9)
    params = {
        # conv weights stored pre-reshaped for the im2col matmul:
        # (kh, kw, cin, cout) -> (kh*kw*cin, cout)
        "w1": (0.1 * jax.random.normal(ks[0], (3, 3, in_channels, out_channels))
               ).reshape(3 * 3 * in_channels, out_channels),
        "w2": (0.1 * jax.random.normal(ks[1], (3, 3, out_channels, out_channels))
               ).reshape(3 * 3 * out_channels, out_channels),
        "g1": 1.0 + 0.1 * jax.random.normal(ks[2], (out_channels,)),
        "b1": 0.1 * jax.random.normal(ks[3], (out_channels,)),
        "g2": 1.0 + 0.1 * jax.random.normal(ks[4], (out_channels,)),
        "b2": 0.1 * jax.random.normal(ks[5], (out_channels,)),
    }
    if stride != 1 and in_channels != out_channels:
        params["w_res"] = (0.1 * jax.random.normal(
            ks[6], (1, 1, in_channels, out_channels))
        ).reshape(in_channels, out_channels)
        params["g_res"] = 1.0 + 0.1 * jax.random.normal(ks[7], (out_channels,))
        params["b_res"] = 0.1 * jax.random.normal(ks[8], (out_channels,))
    return params


if __name__ == "__main__":
    in_channels, out_channels, stride, padding = 4, 8, 2, 1  # activates shortcut
    key = jax.random.PRNGKey(0)
    k_x, k_p = jax.random.split(key)

    x = jax.random.normal(k_x, (2, in_channels, 16, 16), dtype=jnp.float32)
    params = init_params(k_p, in_channels, out_channels, stride)

    fwd = jax.jit(functools.partial(resblock_forward, stride=stride,
                                    padding=padding))
    out = fwd(x, params)
    jax.block_until_ready(out)

    assert out.shape == (2, out_channels, 8, 8), out.shape
    assert bool(jnp.all(jnp.isfinite(out)))
    assert bool(jnp.all(out >= 0.0))   # final ReLU
    print("KERNEL_OK")
</pallas_src>

<mosaic_0001>
module attributes {stable_mosaic.version = 11 : i64} {
  func.func @kernel(%arg0: i32, %arg1: memref<64x128xbf16, #tpu.memory_space<vmem>>, %arg2: memref<128x128xbf16, #tpu.memory_space<vmem>>, %arg3: memref<64x128xbf16, #tpu.memory_space<vmem>>, %arg4: memref<1x2x128xf32, #tpu.memory_space<vmem>>) attributes {dimension_semantics = [#tpu.dimension_semantics<parallel>], iteration_bounds = array<i64: 2>, scalar_prefetch = 0 : i64, scratch_operands = 0 : i64, tpu.core_type = #tpu.core_type<tc>, window_params = [{transform_indices = @transform_0, window_bounds = array<i64: 64, 128>}, {pipeline_mode = #tpu.pipeline_mode<synchronous>, transform_indices = @transform_1, window_bounds = array<i64: 128, 128>}, {transform_indices = @transform_2, window_bounds = array<i64: 64, 128>}, {transform_indices = @transform_3, window_bounds = array<i64: 1, 2, 128>}]} {
    %c0 = arith.constant 0 : index
    %c0_0 = arith.constant 0 : index
    %0 = vector.load %arg1[%c0, %c0_0] : memref<64x128xbf16, #tpu.memory_space<vmem>>, vector<64x128xbf16>
    %c0_1 = arith.constant 0 : index
    %c0_2 = arith.constant 0 : index
    %1 = vector.load %arg2[%c0_1, %c0_2] : memref<128x128xbf16, #tpu.memory_space<vmem>>, vector<128x128xbf16>
    %cst = arith.constant dense<0.000000e+00> : vector<64x128xf32>
    %2 = tpu.matmul %0, %1, %cst {dimension_numbers = #tpu.dot_dimension_numbers<[1], [0], [0], [1], [0, 0, 1, 1], [], []>} : vector<64x128xbf16>, vector<128x128xbf16>, vector<64x128xf32> -> vector<64x128xf32>
    %3 = arith.truncf %2 : vector<64x128xf32> to vector<64x128xbf16>
    %c0_3 = arith.constant 0 : index
    %c0_4 = arith.constant 0 : index
    %4 = vector.load %arg3[%c0_3, %c0_4] : memref<64x128xbf16, #tpu.memory_space<vmem>>, vector<64x128xbf16>
    tpu.vector_store %arg3[%c0_3, %c0_4], %3 {strides = array<i32>} : memref<64x128xbf16, #tpu.memory_space<vmem>>, vector<64x128xbf16>,
    %cst_5 = arith.constant dense<0.000000e+00> : vector<128xf32>
    %5 = vector.multi_reduction <add>, %2, %cst_5 [0] : vector<64x128xf32> to vector<128xf32>
    %6 = vector.shape_cast %5 : vector<128xf32> to vector<1x128xf32>
    %7 = vector.shape_cast %6 : vector<1x128xf32> to vector<1x1x128xf32>
    %c0_6 = arith.constant 0 : index
    %c0_7 = arith.constant 0 : index
    %c0_8 = arith.constant 0 : index
    %8 = vector.load %arg4[%c0_6, %c0_7, %c0_8] : memref<1x2x128xf32, #tpu.memory_space<vmem>>, vector<1x1x128xf32>
    tpu.vector_store %arg4[%c0_6, %c0_7, %c0_8], %7 {strides = array<i32>} : memref<1x2x128xf32, #tpu.memory_space<vmem>>, vector<1x1x128xf32>,
    %9 = arith.mulf %2, %2 : vector<64x128xf32>
    %cst_9 = arith.constant dense<0.000000e+00> : vector<128xf32>
    %10 = vector.multi_reduction <add>, %9, %cst_9 [0] : vector<64x128xf32> to vector<128xf32>
    %11 = vector.shape_cast %10 : vector<128xf32> to vector<1x128xf32>
    %12 = vector.shape_cast %11 : vector<1x128xf32> to vector<1x1x128xf32>
    %c0_10 = arith.constant 0 : index
    %c1 = arith.constant 1 : index
    %c0_11 = arith.constant 0 : index
    %13 = vector.load %arg4[%c0_10, %c1, %c0_11] : memref<1x2x128xf32, #tpu.memory_space<vmem>>, vector<1x1x128xf32>
    tpu.vector_store %arg4[%c0_10, %c1, %c0_11], %12 {strides = array<i32>} : memref<1x2x128xf32, #tpu.memory_space<vmem>>, vector<1x1x128xf32>,
    return
  }
  func.func @transform_0(%arg0: i32) -> (i32, i32) {
    %c0_i32 = arith.constant 0 : i32
    %c0_i32_0 = arith.constant 0 : i32
    return %arg0, %c0_i32 : i32, i32
  }
  func.func @transform_1(%arg0: i32) -> (i32, i32) {
    %c0_i32 = arith.constant 0 : i32
    %c0_i32_0 = arith.constant 0 : i32
    %c0_i32_1 = arith.constant 0 : i32
    return %c0_i32, %c0_i32_0 : i32, i32
  }
  func.func @transform_2(%arg0: i32) -> (i32, i32) {
    %c0_i32 = arith.constant 0 : i32
    %c0_i32_0 = arith.constant 0 : i32
    return %arg0, %c0_i32 : i32, i32
  }
  func.func @transform_3(%arg0: i32) -> (i32, i32, i32) {
    %c0_i32 = arith.constant 0 : i32
    %c0_i32_0 = arith.constant 0 : i32
    %c0_i32_1 = arith.constant 0 : i32
    return %arg0, %c0_i32, %c0_i32_0 : i32, i32, i32
  }
}

module attributes {stable_mosaic.version = 11 : i64} {
  func.func @kernel(%arg0: i32, %arg1: memref<64x128xbf16, #tpu.memory_space<vmem>>, %arg2: memref<1x128xf32, #tpu.memory_space<vmem>>, %arg3: memref<1x128xf32, #tpu.memory_space<vmem>>, %arg4: memref<64x128xbf16, #tpu.memory_space<vmem>>) attributes {dimension_semantics = [#tpu.dimension_semantics<parallel>], iteration_bounds = array<i64: 2>, scalar_prefetch = 0 : i64, scratch_operands = 0 : i64, tpu.core_type = #tpu.core_type<tc>, window_params = [{transform_indices = @transform_0, window_bounds = array<i64: 64, 128>}, {pipeline_mode = #tpu.pipeline_mode<synchronous>, transform_indices = @transform_1, window_bounds = array<i64: 1, 128>}, {pipeline_mode = #tpu.pipeline_mode<synchronous>, transform_indices = @transform_2, window_bounds = array<i64: 1, 128>}, {transform_indices = @transform_3, window_bounds = array<i64: 64, 128>}]} {
    %c0 = arith.constant 0 : index
    %c0_0 = arith.constant 0 : index
    %0 = vector.load %arg1[%c0, %c0_0] : memref<64x128xbf16, #tpu.memory_space<vmem>>, vector<64x128xbf16>
    %1 = arith.extf %0 : vector<64x128xbf16> to vector<64x128xf32>
    %c0_1 = arith.constant 0 : index
    %c0_2 = arith.constant 0 : index
    %2 = vector.load %arg2[%c0_1, %c0_2] : memref<1x128xf32, #tpu.memory_space<vmem>>, vector<1x128xf32>
    %3 = vector.broadcast %2 : vector<1x128xf32> to vector<64x128xf32>
    %4 = arith.mulf %1, %3 : vector<64x128xf32>
    %c0_3 = arith.constant 0 : index
    %c0_4 = arith.constant 0 : index
    %5 = vector.load %arg3[%c0_3, %c0_4] : memref<1x128xf32, #tpu.memory_space<vmem>>, vector<1x128xf32>
    %6 = vector.broadcast %5 : vector<1x128xf32> to vector<64x128xf32>
    %7 = arith.addf %4, %6 : vector<64x128xf32>
    %cst = arith.constant 0.000000e+00 : f32
    %8 = vector.broadcast %cst : f32 to vector<64x128xf32>
    %9 = arith.maximumf %7, %8 : vector<64x128xf32>
    %10 = arith.truncf %9 : vector<64x128xf32> to vector<64x128xbf16>
    %c0_5 = arith.constant 0 : index
    %c0_6 = arith.constant 0 : index
    %11 = vector.load %arg4[%c0_5, %c0_6] : memref<64x128xbf16, #tpu.memory_space<vmem>>, vector<64x128xbf16>
    tpu.vector_store %arg4[%c0_5, %c0_6], %10 {strides = array<i32>} : memref<64x128xbf16, #tpu.memory_space<vmem>>, vector<64x128xbf16>,
    return
  }
  func.func @transform_0(%arg0: i32) -> (i32, i32) {
    %c0_i32 = arith.constant 0 : i32
    %c0_i32_0 = arith.constant 0 : i32
    return %arg0, %c0_i32 : i32, i32
  }
  func.func @transform_1(%arg0: i32) -> (i32, i32) {
    %c0_i32 = arith.constant 0 : i32
    %c0_i32_0 = arith.constant 0 : i32
    %c0_i32_1 = arith.constant 0 : i32
    return %c0_i32, %c0_i32_0 : i32, i32
  }
  func.func @transform_2(%arg0: i32) -> (i32, i32) {
    %c0_i32 = arith.constant 0 : i32
    %c0_i32_0 = arith.constant 0 : i32
    %c0_i32_1 = arith.constant 0 : i32
    return %c0_i32, %c0_i32_0 : i32, i32
  }
  func.func @transform_3(%arg0: i32) -> (i32, i32) {
    %c0_i32 = arith.constant 0 : i32
    %c0_i32_0 = arith.constant 0 : i32
    return %arg0, %c0_i32 : i32, i32
  }
}

module attributes {stable_mosaic.version = 11 : i64} {
  func.func @kernel(%arg0: i32, %arg1: memref<64x128xbf16, #tpu.memory_space<vmem>>, %arg2: memref<128x128xbf16, #tpu.memory_space<vmem>>, %arg3: memref<64x128xbf16, #tpu.memory_space<vmem>>, %arg4: memref<128x128xbf16, #tpu.memory_space<vmem>>, %arg5: memref<64x128xbf16, #tpu.memory_space<vmem>>, %arg6: memref<1x2x128xf32, #tpu.memory_space<vmem>>, %arg7: memref<1x2x128xf32, #tpu.memory_space<vmem>>) attributes {dimension_semantics = [#tpu.dimension_semantics<parallel>], iteration_bounds = array<i64: 2>, scalar_prefetch = 0 : i64, scratch_operands = 0 : i64, tpu.core_type = #tpu.core_type<tc>, window_params = [{transform_indices = @transform_0, window_bounds = array<i64: 64, 128>}, {pipeline_mode = #tpu.pipeline_mode<synchronous>, transform_indices = @transform_1, window_bounds = array<i64: 128, 128>}, {transform_indices = @transform_2, window_bounds = array<i64: 64, 128>}, {pipeline_mode = #tpu.pipeline_mode<synchronous>, transform_indices = @transform_3, window_bounds = array<i64: 128, 128>}, {transform_indices = @transform_4, window_bounds = array<i64: 64, 128>}, {transform_indices = @transform_5, window_bounds = array<i64: 1, 2, 128>}, {transform_indices = @transform_6, window_bounds = array<i64: 1, 2, 128>}]} {
    %c0 = arith.constant 0 : index
    %c0_0 = arith.constant 0 : index
    %0 = vector.load %arg1[%c0, %c0_0] : memref<64x128xbf16, #tpu.memory_space<vmem>>, vector<64x128xbf16>
    %c0_1 = arith.constant 0 : index
    %c0_2 = arith.constant 0 : index
    %1 = vector.load %arg2[%c0_1, %c0_2] : memref<128x128xbf16, #tpu.memory_space<vmem>>, vector<128x128xbf16>
    %cst = arith.constant dense<0.000000e+00> : vector<64x128xf32>
    %2 = tpu.matmul %0, %1, %cst {dimension_numbers = #tpu.dot_dimension_numbers<[1], [0], [0], [1], [0, 0, 1, 1], [], []>} : vector<64x128xbf16>, vector<128x128xbf16>, vector<64x128xf32> -> vector<64x128xf32>
    %3 = arith.truncf %2 : vector<64x128xf32> to vector<64x128xbf16>
    %c0_3 = arith.constant 0 : index
    %c0_4 = arith.constant 0 : index
    %4 = vector.load %arg5[%c0_3, %c0_4] : memref<64x128xbf16, #tpu.memory_space<vmem>>, vector<64x128xbf16>
    tpu.vector_store %arg5[%c0_3, %c0_4], %3 {strides = array<i32>} : memref<64x128xbf16, #tpu.memory_space<vmem>>, vector<64x128xbf16>,
    %cst_5 = arith.constant dense<0.000000e+00> : vector<128xf32>
    %5 = vector.multi_reduction <add>, %2, %cst_5 [0] : vector<64x128xf32> to vector<128xf32>
    %6 = vector.shape_cast %5 : vector<128xf32> to vector<1x128xf32>
    %7 = vector.shape_cast %6 : vector<1x128xf32> to vector<1x1x128xf32>
    %c0_6 = arith.constant 0 : index
    %c0_7 = arith.constant 0 : index
    %c0_8 = arith.constant 0 : index
    %8 = vector.load %arg6[%c0_6, %c0_7, %c0_8] : memref<1x2x128xf32, #tpu.memory_space<vmem>>, vector<1x1x128xf32>
    tpu.vector_store %arg6[%c0_6, %c0_7, %c0_8], %7 {strides = array<i32>} : memref<1x2x128xf32, #tpu.memory_space<vmem>>, vector<1x1x128xf32>,
    %9 = arith.mulf %2, %2 : vector<64x128xf32>
    %cst_9 = arith.constant dense<0.000000e+00> : vector<128xf32>
    %10 = vector.multi_reduction <add>, %9, %cst_9 [0] : vector<64x128xf32> to vector<128xf32>
    %11 = vector.shape_cast %10 : vector<128xf32> to vector<1x128xf32>
    %12 = vector.shape_cast %11 : vector<1x128xf32> to vector<1x1x128xf32>
    %c0_10 = arith.constant 0 : index
    %c1 = arith.constant 1 : index
    %c0_11 = arith.constant 0 : index
    %13 = vector.load %arg6[%c0_10, %c1, %c0_11] : memref<1x2x128xf32, #tpu.memory_space<vmem>>, vector<1x1x128xf32>
    tpu.vector_store %arg6[%c0_10, %c1, %c0_11], %12 {strides = array<i32>} : memref<1x2x128xf32, #tpu.memory_space<vmem>>, vector<1x1x128xf32>,
    %c0_12 = arith.constant 0 : index
    %c0_13 = arith.constant 0 : index
    %14 = vector.load %arg3[%c0_12, %c0_13] : memref<64x128xbf16, #tpu.memory_space<vmem>>, vector<64x128xbf16>
    %c0_14 = arith.constant 0 : index
    %c0_15 = arith.constant 0 : index
    %15 = vector.load %arg4[%c0_14, %c0_15] : memref<128x128xbf16, #tpu.memory_space<vmem>>, vector<128x128xbf16>
    %cst_16 = arith.constant dense<0.000000e+00> : vector<64x128xf32>
    %16 = tpu.matmul %14, %15, %cst_16 {dimension_numbers = #tpu.dot_dimension_numbers<[1], [0], [0], [1], [0, 0, 1, 1], [], []>} : vector<64x128xbf16>, vector<128x128xbf16>, vector<64x128xf32> -> vector<64x128xf32>
    %cst_17 = arith.constant dense<0.000000e+00> : vector<128xf32>
    %17 = vector.multi_reduction <add>, %16, %cst_17 [0] : vector<64x128xf32> to vector<128xf32>
    %18 = vector.shape_cast %17 : vector<128xf32> to vector<1x128xf32>
    %19 = vector.shape_cast %18 : vector<1x128xf32> to vector<1x1x128xf32>
    %c0_18 = arith.constant 0 : index
    %c0_19 = arith.constant 0 : index
    %c0_20 = arith.constant 0 : index
    %20 = vector.load %arg7[%c0_18, %c0_19, %c0_20] : memref<1x2x128xf32, #tpu.memory_space<vmem>>, vector<1x1x128xf32>
    tpu.vector_store %arg7[%c0_18, %c0_19, %c0_20], %19 {strides = array<i32>} : memref<1x2x128xf32, #tpu.memory_space<vmem>>, vector<1x1x128xf32>,
    %21 = arith.mulf %16, %16 : vector<64x128xf32>
    %cst_21 = arith.constant dense<0.000000e+00> : vector<128xf32>
    %22 = vector.multi_reduction <add>, %21, %cst_21 [0] : vector<64x128xf32> to vector<128xf32>
    %23 = vector.shape_cast %22 : vector<128xf32> to vector<1x128xf32>
    %24 = vector.shape_cast %23 : vector<1x128xf32> to vector<1x1x128xf32>
    %c0_22 = arith.constant 0 : index
    %c1_23 = arith.constant 1 : index
    %c0_24 = arith.constant 0 : index
    %25 = vector.load %arg7[%c0_22, %c1_23, %c0_24] : memref<1x2x128xf32, #tpu.memory_space<vmem>>, vector<1x1x128xf32>
    tpu.vector_store %arg7[%c0_22, %c1_23, %c0_24], %24 {strides = array<i32>} : memref<1x2x128xf32, #tpu.memory_space<vmem>>, vector<1x1x128xf32>,
    return
  }
  func.func @transform_0(%arg0: i32) -> (i32, i32) {
    %c0_i32 = arith.constant 0 : i32
    %c0_i32_0 = arith.constant 0 : i32
    return %arg0, %c0_i32 : i32, i32
  }
  func.func @transform_1(%arg0: i32) -> (i32, i32) {
    %c0_i32 = arith.constant 0 : i32
    %c0_i32_0 = arith.constant 0 : i32
    %c0_i32_1 = arith.constant 0 : i32
    return %c0_i32, %c0_i32_0 : i32, i32
  }
  func.func @transform_2(%arg0: i32) -> (i32, i32) {
    %c0_i32 = arith.constant 0 : i32
    %c0_i32_0 = arith.constant 0 : i32
    return %arg0, %c0_i32 : i32, i32
  }
  func.func @transform_3(%arg0: i32) -> (i32, i32) {
    %c0_i32 = arith.constant 0 : i32
    %c0_i32_0 = arith.constant 0 : i32
    %c0_i32_1 = arith.constant 0 : i32
    return %c0_i32, %c0_i32_0 : i32, i32
  }
  func.func @transform_4(%arg0: i32) -> (i32, i32) {
    %c0_i32 = arith.constant 0 : i32
    %c0_i32_0 = arith.constant 0 : i32
    return %arg0, %c0_i32 : i32, i32
  }
  func.func @transform_5(%arg0: i32) -> (i32, i32, i32) {
    %c0_i32 = arith.constant 0 : i32
    %c0_i32_0 = arith.constant 0 : i32
    %c0_i32_1 = arith.constant 0 : i32
    return %arg0, %c0_i32, %c0_i32_0 : i32, i32, i32
  }
  func.func @transform_6(%arg0: i32) -> (i32, i32, i32) {
    %c0_i32 = arith.constant 0 : i32
    %c0_i32_0 = arith.constant 0 : i32
    %c0_i32_1 = arith.constant 0 : i32
    return %arg0, %c0_i32, %c0_i32_0 : i32, i32, i32
  }
}

module attributes {stable_mosaic.version = 11 : i64} {
  func.func @kernel(%arg0: i32, %arg1: memref<64x128xbf16, #tpu.memory_space<vmem>>, %arg2: memref<1x128xf32, #tpu.memory_space<vmem>>, %arg3: memref<1x128xf32, #tpu.memory_space<vmem>>, %arg4: memref<64x128xbf16, #tpu.memory_space<vmem>>, %arg5: memref<128x128xbf16, #tpu.memory_space<vmem>>, %arg6: memref<1x128xf32, #tpu.memory_space<vmem>>, %arg7: memref<1x128xf32, #tpu.memory_space<vmem>>, %arg8: memref<64x128xf32, #tpu.memory_space<vmem>>) attributes {dimension_semantics = [#tpu.dimension_semantics<parallel>], iteration_bounds = array<i64: 2>, scalar_prefetch = 0 : i64, scratch_operands = 0 : i64, tpu.core_type = #tpu.core_type<tc>, window_params = [{transform_indices = @transform_0, window_bounds = array<i64: 64, 128>}, {pipeline_mode = #tpu.pipeline_mode<synchronous>, transform_indices = @transform_1, window_bounds = array<i64: 1, 128>}, {pipeline_mode = #tpu.pipeline_mode<synchronous>, transform_indices = @transform_2, window_bounds = array<i64: 1, 128>}, {transform_indices = @transform_3, window_bounds = array<i64: 64, 128>}, {pipeline_mode = #tpu.pipeline_mode<synchronous>, transform_indices = @transform_4, window_bounds = array<i64: 128, 128>}, {pipeline_mode = #tpu.pipeline_mode<synchronous>, transform_indices = @transform_5, window_bounds = array<i64: 1, 128>}, {pipeline_mode = #tpu.pipeline_mode<synchronous>, transform_indices = @transform_6, window_bounds = array<i64: 1, 128>}, {transform_indices = @transform_7, window_bounds = array<i64: 64, 128>}]} {
    %c0 = arith.constant 0 : index
    %c0_0 = arith.constant 0 : index
    %0 = vector.load %arg1[%c0, %c0_0] : memref<64x128xbf16, #tpu.memory_space<vmem>>, vector<64x128xbf16>
    %1 = arith.extf %0 : vector<64x128xbf16> to vector<64x128xf32>
    %c0_1 = arith.constant 0 : index
    %c0_2 = arith.constant 0 : index
    %2 = vector.load %arg2[%c0_1, %c0_2] : memref<1x128xf32, #tpu.memory_space<vmem>>, vector<1x128xf32>
    %3 = vector.broadcast %2 : vector<1x128xf32> to vector<64x128xf32>
    %4 = arith.mulf %1, %3 : vector<64x128xf32>
    %c0_3 = arith.constant 0 : index
    %c0_4 = arith.constant 0 : index
    %5 = vector.load %arg3[%c0_3, %c0_4] : memref<1x128xf32, #tpu.memory_space<vmem>>, vector<1x128xf32>
    %6 = vector.broadcast %5 : vector<1x128xf32> to vector<64x128xf32>
    %7 = arith.addf %4, %6 : vector<64x128xf32>
    %c0_5 = arith.constant 0 : index
    %c0_6 = arith.constant 0 : index
    %8 = vector.load %arg4[%c0_5, %c0_6] : memref<64x128xbf16, #tpu.memory_space<vmem>>, vector<64x128xbf16>
    %c0_7 = arith.constant 0 : index
    %c0_8 = arith.constant 0 : index
    %9 = vector.load %arg5[%c0_7, %c0_8] : memref<128x128xbf16, #tpu.memory_space<vmem>>, vector<128x128xbf16>
    %cst = arith.constant dense<0.000000e+00> : vector<64x128xf32>
    %10 = tpu.matmul %8, %9, %cst {dimension_numbers = #tpu.dot_dimension_numbers<[1], [0], [0], [1], [0, 0, 1, 1], [], []>} : vector<64x128xbf16>, vector<128x128xbf16>, vector<64x128xf32> -> vector<64x128xf32>
    %c0_9 = arith.constant 0 : index
    %c0_10 = arith.constant 0 : index
    %11 = vector.load %arg6[%c0_9, %c0_10] : memref<1x128xf32, #tpu.memory_space<vmem>>, vector<1x128xf32>
    %12 = vector.broadcast %11 : vector<1x128xf32> to vector<64x128xf32>
    %13 = arith.mulf %10, %12 : vector<64x128xf32>
    %c0_11 = arith.constant 0 : index
    %c0_12 = arith.constant 0 : index
    %14 = vector.load %arg7[%c0_11, %c0_12] : memref<1x128xf32, #tpu.memory_space<vmem>>, vector<1x128xf32>
    %15 = vector.broadcast %14 : vector<1x128xf32> to vector<64x128xf32>
    %16 = arith.addf %13, %15 : vector<64x128xf32>
    %17 = arith.addf %7, %16 : vector<64x128xf32>
    %cst_13 = arith.constant 0.000000e+00 : f32
    %18 = vector.broadcast %cst_13 : f32 to vector<64x128xf32>
    %19 = arith.maximumf %17, %18 : vector<64x128xf32>
    %c0_14 = arith.constant 0 : index
    %c0_15 = arith.constant 0 : index
    %20 = vector.load %arg8[%c0_14, %c0_15] : memref<64x128xf32, #tpu.memory_space<vmem>>, vector<64x128xf32>
    tpu.vector_store %arg8[%c0_14, %c0_15], %19 {strides = array<i32>} : memref<64x128xf32, #tpu.memory_space<vmem>>, vector<64x128xf32>,
    return
  }
  func.func @transform_0(%arg0: i32) -> (i32, i32) {
    %c0_i32 = arith.constant 0 : i32
    %c0_i32_0 = arith.constant 0 : i32
    return %arg0, %c0_i32 : i32, i32
  }
  func.func @transform_1(%arg0: i32) -> (i32, i32) {
    %c0_i32 = arith.constant 0 : i32
    %c0_i32_0 = arith.constant 0 : i32
    %c0_i32_1 = arith.constant 0 : i32
    return %c0_i32, %c0_i32_0 : i32, i32
  }
  func.func @transform_2(%arg0: i32) -> (i32, i32) {
    %c0_i32 = arith.constant 0 : i32
    %c0_i32_0 = arith.constant 0 : i32
    %c0_i32_1 = arith.constant 0 : i32
    return %c0_i32, %c0_i32_0 : i32, i32
  }
  func.func @transform_3(%arg0: i32) -> (i32, i32) {
    %c0_i32 = arith.constant 0 : i32
    %c0_i32_0 = arith.constant 0 : i32
    return %arg0, %c0_i32 : i32, i32
  }
  func.func @transform_4(%arg0: i32) -> (i32, i32) {
    %c0_i32 = arith.constant 0 : i32
    %c0_i32_0 = arith.constant 0 : i32
    %c0_i32_1 = arith.constant 0 : i32
    return %c0_i32, %c0_i32_0 : i32, i32
  }
  func.func @transform_5(%arg0: i32) -> (i32, i32) {
    %c0_i32 = arith.constant 0 : i32
    %c0_i32_0 = arith.constant 0 : i32
    %c0_i32_1 = arith.constant 0 : i32
    return %c0_i32, %c0_i32_0 : i32, i32
  }
  func.func @transform_6(%arg0: i32) -> (i32, i32) {
    %c0_i32 = arith.constant 0 : i32
    %c0_i32_0 = arith.constant 0 : i32
    %c0_i32_1 = arith.constant 0 : i32
    return %c0_i32, %c0_i32_0 : i32, i32
  }
  func.func @transform_7(%arg0: i32) -> (i32, i32) {
    %c0_i32 = arith.constant 0 : i32
    %c0_i32_0 = arith.constant 0 : i32
    return %arg0, %c0_i32 : i32, i32
  }
}

</mosaic_0001>

<bundles_post_ra>
// kernel: resblock_forward.5
= control target key start
LH: loop header
LB: loop body
LE: loop exit
PB: predicated region body
PF: predicated region fallthrough
CT: control target
= control target key end

     0   :  { %s431_s12 = smov 0   ;;  %s461_s0 = inlined_call_operand.vmem [shape: bf16[128,128], index: 0, kind: input, shape index: {}]   ;;  %s462_s1 = inlined_call_operand.vmem [shape: f32[1,128], index: 1, kind: input, shape index: {}]   ;;  %s463_s2 = inlined_call_operand.vmem [shape: f32[1,128], index: 2, kind: input, shape index: {}]   ;;  %s464_s3 = inlined_call_operand.vmem [shape: bf16[128,128], index: 3, kind: output, shape index: {}]  }
   0x1 LB: > { %s324_s13 = sadd.s32 4294967295, %s409_s12   ;;  %p328_p0 = scmp.ge.s32.totalorder %s409_s12, 1  ;;  %s409_s12 = sphi %s431_s12, %s13_s12  }
   0x2   : > { %p138_p1 = scmp.lt.s32.totalorder %s409_s12, 3 }
   0x4   : > { %p139_p2 = pnand %p328_p0, %p138_p1 }
   0x5   : > { %s329_s14 = sshll.u32 (!%p139_p2), %s324_s13, 3  ;;  %v333_v0 = vld [vmem:[%s462_s1] ss:$0 sm:$0xff] (!%p139_p2) }
   0x6   : > { %142 = sbr.rel (%p139_p2) target bundleno = 29 (0x1d), region = 32  ;;  %p163_p3 = scmp.lt.s32.totalorder (!%p139_p2), %s329_s14, 15  ;;  %v334_v9 = vld [vmem:[%s463_s2] ss:$0 sm:$0xff] (!%p139_p2) }
   0xd   : > { %s466_s14 = smov (!%p163_p3, %s329_s14), 15 }
   0xe   : > { %s330_s15 = sshll.u32 %s466_s14, 2 }
   0xf   : > { %s166_s18 = scalar_lea.vmem %s461_s0, %s330_s15  ;;  %s172_s25 = scalar_lea.vmem %s464_s3, %s330_s15 }
  0x10   : > { %v354_v1 = vld [vmem:[%s166_s18] sm:$0xff]   ;;  %v389_v2 = vld [vmem:[%s166_s18 + $0x8] sm:$0xff]   ;;  %v390_v3 = vld [vmem:[%s166_s18 + $0x10] sm:$0xff]  }
  0x11   : > { %v355_v4 = vunpack.c.l.bf16 %v354_v1  ;;  %v356_v5 = vunpack.c.h.bf16 %v354_v1  ;;  %v359_v6 = vunpack.c.l.bf16 %v389_v2  ;;  %v360_v7 = vunpack.c.h.bf16 %v389_v2  ;;  %v391_v8 = vld [vmem:[%s166_s18 + $0x18] sm:$0xff]  }
  0x12   : > { %v363_v10 = vunpack.c.l.bf16 %v390_v3  ;;  %v364_v11 = vunpack.c.h.bf16 %v390_v3  ;;  %v367_v12 = vunpack.c.l.bf16 %v391_v8  ;;  %v368_v13 = vunpack.c.h.bf16 %v391_v8 }
  0x13   : > { %v197_v14 = vmul.f32 %v355_v4, %v333_v0  ;;  %v198_v15 = vmul.f32 %v356_v5, %v333_v0  ;;  %v199_v16 = vmul.f32 %v359_v6, %v333_v0  ;;  %v200_v17 = vmul.f32 %v360_v7, %v333_v0 }
  0x14   : > { %v201_v18 = vmul.f32 %v363_v10, %v333_v0  ;;  %v202_v19 = vmul.f32 %v364_v11, %v333_v0  ;;  %v203_v20 = vmul.f32 %v367_v12, %v333_v0  ;;  %v204_v21 = vmul.f32 %v368_v13, %v333_v0 }
  0x15   : > { %v212_v22 = vadd.f32 %v334_v9, %v197_v14  ;;  %v213_v23 = vadd.f32 %v334_v9, %v198_v15  ;;  %v214_v24 = vadd.f32 %v334_v9, %v199_v16  ;;  %v215_v25 = vadd.f32 %v334_v9, %v200_v17 }
  0x16   : > { %v216_v26 = vadd.f32 %v334_v9, %v201_v18  ;;  %v217_v27 = vadd.f32 %v334_v9, %v202_v19  ;;  %v218_v28 = vadd.f32 %v334_v9, %v203_v20  ;;  %v219_v29 = vadd.f32 %v334_v9, %v204_v21 }
  0x17   : > { %v220_v30 = vmax.f32 %v212_v22, 0.0  ;;  %v221_v31 = vmax.f32 %v213_v23, 0.0  ;;  %v222_v32 = vmax.f32 %v214_v24, 0.0  ;;  %v223_v33 = vmax.f32 %v215_v25, 0.0 }
  0x18   : > { %v224_v34 = vmax.f32 %v216_v26, 0.0  ;;  %v225_v35 = vmax.f32 %v217_v27, 0.0  ;;  %v226_v36 = vmax.f32 %v218_v28, 0.0  ;;  %v227_v37 = vmax.f32 %v219_v29, 0.0 }
  0x19   : > { %v372_v38 = vpack.c.bf16 %v221_v31, %v220_v30  ;;  %v377_v39 = vpack.c.bf16 %v223_v33, %v222_v32 }
  0x1a   : > { %v382_v40 = vpack.c.bf16 %v225_v35, %v224_v34  ;;  %v387_v41 = vpack.c.bf16 %v227_v37, %v226_v36 }
  0x1b   : > { %373 = vst [vmem:[%s172_s25] sm:$0xff] %v372_v38   ;;  %392 = vst [vmem:[%s172_s25 + $0x8] sm:$0xff] %v377_v39  }
  0x1c   : > { %393 = vst [vmem:[%s172_s25 + $0x10] sm:$0xff] %v382_v40   ;;  %394 = vst [vmem:[%s172_s25 + $0x18] sm:$0xff] %v387_v41  }
  0x1d PF: > { %s13_s12 = sadd.s32 1, %s409_s12  }
  0x1e   : > { %p10_p4 = scmp.ge.s32.totalorder %s13_s12, 4  }
  0x20   :  { %12 = sbr.rel (!%p10_p4) target bundleno = 1 (0x1), region = 62 }

// kernel: resblock_forward.4
= control target key start
LH: loop header
LB: loop body
LE: loop exit
PB: predicated region body
PF: predicated region fallthrough
CT: control target
= control target key end

     0   :  { %s673_s12 = smov 0   ;;  %s735_s0 = inlined_call_operand.vmem [shape: bf16[128,128], index: 0, kind: input, shape index: {}]   ;;  %s736_s1 = inlined_call_operand.vmem [shape: bf16[128,128], index: 1, kind: input, shape index: {}]   ;;  %s737_s2 = inlined_call_operand.vmem [shape: bf16[128,128], index: 2, kind: output, shape index: {0}]   ;;  %s738_s3 = inlined_call_operand.vmem [shape: f32[2,2,128], index: 3, kind: output, shape index: {1}]  }
   0x1 LB: > { %s679_s13 = sadd.s32 4294967295, %s651_s12   ;;  %p514_p0 = scmp.ge.s32.totalorder %s651_s12, 1  ;;  %s651_s12 = sphi %s673_s12, %s14_s12  }
   0x2   : > { %p141_p1 = scmp.lt.s32.totalorder %s651_s12, 3 }
   0x4   : > { %p142_p2 = pnand %p514_p0, %p141_p1 }
   0x5   : > { %v633_v0 = vld [vmem:[%s736_s1] sm:$0xff] (!%p142_p2)   ;;  %s515_s16 = sshll.u32 (!%p142_p2), %s679_s13, 3  ;;  %v634_v1 = vld [vmem:[%s736_s1 + $0x8] sm:$0xff] (!%p142_p2)   ;;  %v635_v2 = vld [vmem:[%s736_s1 + $0x10] sm:$0xff] (!%p142_p2)   ;;  %p181_p4 = scmp.lt.s32.totalorder (!%p142_p2), %s679_s13, 1 }
   0x6   : > { %145 = sbr.rel (%p142_p2) target bundleno = 282 (0x11a), region = 28  ;;  %p170_p3 = scmp.lt.s32.totalorder (!%p142_p2), %s515_s16, 15  ;;  %585 = vmatprep.subr.bf16.mxu0 (!%p142_p2), %v633_v0  ;;  %609 = vmatprep.subr.bf16.mxu1 (!%p142_p2), %v633_v0  ;;  %v636_v3 = vld [vmem:[%s736_s1 + $0x18] sm:$0xff] (!%p142_p2)   ;;  %v637_v6 = vld [vmem:[%s736_s1 + $0x20] sm:$0xff] (!%p142_p2)   ;;  %v638_v7 = vld [vmem:[%s736_s1 + $0x28] sm:$0xff] (!%p142_p2)  }
   0x7   : > { %586 = vmatpush3.bf16.msra.mxu0 (!%p142_p2), %v633_v0  ;;  %617 = vmatpush3.bf16.msra.mxu1 (!%p142_p2), %v633_v0  ;;  %v639_v8 = vld [vmem:[%s736_s1 + $0x30] sm:$0xff] (!%p142_p2)   ;;  %v640_v9 = vld [vmem:[%s736_s1 + $0x38] sm:$0xff] (!%p142_p2)  }
   0x8   : > { %587 = vmatprep.subr.bf16.mxu0 (!%p142_p2), %v634_v1  ;;  %610 = vmatprep.subr.bf16.mxu1 (!%p142_p2), %v634_v1 }
   0xb   : > { %588 = vmatpush3.bf16.msra.mxu0 (!%p142_p2), %v634_v1  ;;  %618 = vmatpush3.bf16.msra.mxu1 (!%p142_p2), %v634_v1 }
   0xc   : > { %589 = vmatprep.subr.bf16.mxu0 (!%p142_p2), %v635_v2  ;;  %611 = vmatprep.subr.bf16.mxu1 (!%p142_p2), %v635_v2 }
   0xd   : > { %s740_s16 = smov (!%p170_p3, %s515_s16), 15  ;;  %s742_s13 = smov (!%p181_p4, %s679_s13), 1 }
   0xe   : > { %s516_s21 = sshll.u32 %s740_s16, 2  ;;  %s519_s11 = sshll.u32 %s742_s13, 1 }
   0xf   : > { %s701_s24 = scalar_lea.vmem %s735_s0, %s516_s21  ;;  %590 = vmatpush3.bf16.msra.mxu0 %v635_v2  ;;  %619 = vmatpush3.bf16.msra.mxu1 %v635_v2  ;;  %s179_s10 = scalar_lea.vmem %s737_s2, %s516_s21 }
  0x10   : > { %v641_v4 = vld [vmem:[%s701_s24] sm:$0xff]   ;;  %v643_v5 = vld [vmem:[%s701_s24 + $0x10] sm:$0xff]   ;;  %591 = vmatprep.subr.bf16.mxu0 %v636_v3  ;;  %612 = vmatprep.subr.bf16.mxu1 %v636_v3  ;;  %v642_v10 = vld [vmem:[%s701_s24 + $0x8] sm:$0xff]   ;;  %s184_s16 = scalar_lea.vmem %s738_s3, %s519_s11 }
  0x11   : > { %601 = vmatprep.mubr.bf16.mxu0 %v641_v4  ;;  %605 = vmatprep.mubr.bf16.mxu1 %v643_v5  ;;  %v644_v11 = vld [vmem:[%s701_s24 + $0x18] sm:$0xff]  }
  0x13   : > { %592 = vmatpush3.bf16.msra.mxu0 %v636_v3  ;;  %620 = vmatpush3.bf16.msra.mxu1 %v636_v3 }
  0x14   : > { %593 = vmatprep.subr.bf16.mxu0 %v637_v6  ;;  %613 = vmatprep.subr.bf16.mxu1 %v637_v6 }
  0x17   : > { %594 = vmatpush3.bf16.msra.mxu0 %v637_v6  ;;  %621 = vmatpush3.bf16.msra.mxu1 %v637_v6 }
  0x18   : > { %595 = vmatprep.subr.bf16.mxu0 %v638_v7  ;;  %614 = vmatprep.subr.bf16.mxu1 %v638_v7 }
  0x1b   : > { %596 = vmatpush3.bf16.msra.mxu0 %v638_v7  ;;  %622 = vmatpush3.bf16.msra.mxu1 %v638_v7 }
  0x1c   : > { %597 = vmatprep.subr.bf16.mxu0 %v639_v8  ;;  %615 = vmatprep.subr.bf16.mxu1 %v639_v8 }
  0x1f   : > { %598 = vmatpush3.bf16.msra.mxu0 %v639_v8  ;;  %623 = vmatpush3.bf16.msra.mxu1 %v639_v8 }
  0x20   : > { %599 = vmatprep.subr.bf16.mxu0 %v640_v9  ;;  %616 = vmatprep.subr.bf16.mxu1 %v640_v9 }
  0x23   : > { %600 = vmatpush3.bf16.msra.mxu0 %v640_v9  ;;  %624 = vmatpush3.bf16.msra.mxu1 %v640_v9 }
  0x26   : > { %602 = vmatmul.mubr.bf16.vlgmr.msra.gmra.mrb[0].mxu0 %v642_v10  ;;  %606 = vmatmul.mubr.bf16.vlgmr.msra.gmra.mrb[0].mxu1 %v644_v11 }
  0xf9   : > { %v603_v12 = vpop.f32.mrb[0].mxu0  ;;  %v607_v13 = vpop.f32.mrb[0].mxu1 }
  0xfa   : > { %v316_v14 = vpop.f32.mrb[1].mxu0  ;;  %v332_v15 = vpop.f32.mrb[1].mxu1  ;;  %v403_v27 = vmul.f32 %v603_v12, %v603_v12  ;;  %v407_v39 = vmul.f32 %v607_v13, %v607_v13 }
  0xfb   : > { %v604_v16 = vpop.f32.mrb[2].mxu0  ;;  %v608_v17 = vpop.f32.mrb[2].mxu1  ;;  %v401_v18 = vmul.f32 %v316_v14, %v316_v14  ;;  %v405_v33 = vmul.f32 %v332_v15, %v332_v15 }
  0xfc   : > { %v558_v19 = vpack.c.bf16 %v604_v16, %v603_v12  ;;  %v319_v20 = vpop.f32.mrb[3].mxu0  ;;  %v568_v21 = vpack.c.bf16 %v608_v17, %v607_v13  ;;  %v335_v22 = vpop.f32.mrb[3].mxu1  ;;  %v404_v30 = vmul.f32 %v604_v16, %v604_v16  ;;  %v408_v42 = vmul.f32 %v608_v17, %v608_v17 }
  0xfd   : > { %v553_v23 = vpack.c.bf16 %v319_v20, %v316_v14  ;;  %v387_v24 = vadd.f32 %v319_v20, %v316_v14  ;;  %v402_v25 = vmul.f32 %v319_v20, %v319_v20  ;;  %v563_v26 = vpack.c.bf16 %v335_v22, %v332_v15 }
  0xfe   : > { %570 = vst [vmem:[%s179_s10 + $0x8] sm:$0xff] %v558_v19   ;;  %572 = vst [vmem:[%s179_s10 + $0x18] sm:$0xff] %v568_v21   ;;  %v406_v38 = vmul.f32 %v335_v22, %v335_v22 }
  0xff   : > { %554 = vst [vmem:[%s179_s10] sm:$0xff] %v553_v23   ;;  %v388_v28 = vadd.f32 %v603_v12, %v387_v24  ;;  %v409_v29 = vadd.f32 %v402_v25, %v401_v18  ;;  %571 = vst [vmem:[%s179_s10 + $0x10] sm:$0xff] %v563_v26  }
 0x101   : > { %v410_v31 = vadd.f32 %v409_v29, %v403_v27  ;;  %v389_v32 = vadd.f32 %v604_v16, %v388_v28 }
 0x103   : > { %v390_v34 = vadd.f32 %v389_v32, %v332_v15  ;;  %v411_v35 = vadd.f32 %v410_v31, %v404_v30 }
 0x105   : > { %v412_v36 = vadd.f32 %v411_v35, %v405_v33  ;;  %v391_v37 = vadd.f32 %v390_v34, %v335_v22 }
 0x107   : > { %v392_v40 = vadd.f32 %v607_v13, %v391_v37  ;;  %v413_v41 = vadd.f32 %v412_v36, %v406_v38 }
 0x109   : > { %v393_v43 = vadd.f32 %v608_v17, %v392_v40  ;;  %v414_v44 = vadd.f32 %v413_v41, %v407_v39 }
 0x10b   : > { %v394_v45 = vrot.slane %v393_v43, 4  ;;  %v415_v46 = vadd.f32 %v414_v44, %v408_v42 }
 0x10d   : > { %v395_v47 = vadd.f32 %v394_v45, %v393_v43  ;;  %v416_v48 = vrot.slane %v415_v46, 4 }
 0x10f   : > { %v396_v49 = vrot.slane %v395_v47, 2  ;;  %v417_v50 = vadd.f32 %v416_v48, %v415_v46 }
 0x111   : > { %v397_v51 = vadd.f32 %v396_v49, %v395_v47  ;;  %v418_v52 = vrot.slane %v417_v50, 2 }
 0x113   : > { %v398_v53 = vrot.slane %v397_v51, 1  ;;  %v419_v54 = vadd.f32 %v418_v52, %v417_v50 }
 0x115   : > { %v399_v55 = vadd.f32 %v398_v53, %v397_v51  ;;  %v420_v56 = vrot.slane %v419_v54, 1 }
 0x117   : > { %400 = vst [vmem:[%s184_s16] sm:$0x1] %v399_v55  ;;  %v421_v57 = vadd.f32 %v420_v56, %v419_v54 }
 0x119   : > { %422 = vst [vmem:[%s184_s16 + $0x1] sm:$0x1] %v421_v57 }
 0x11a PF: > { %s14_s12 = sadd.s32 1, %s651_s12  }
 0x11b   : > { %p11_p5 = scmp.ge.s32.totalorder %s14_s12, 4  }
 0x11d   :  { %13 = sbr.rel (!%p11_p5) target bundleno = 1 (0x1), region = 70 }

// kernel: resblock_forward.7
= control target key start
LH: loop header
LB: loop body
LE: loop exit
PB: predicated region body
PF: predicated region fallthrough
CT: control target
= control target key end

     0   :  { %s802_s24 = smov 0   ;;  %s872_s0 = inlined_call_operand.vmem [shape: bf16[128,128], index: 0, kind: input, shape index: {}]   ;;  %s873_s1 = inlined_call_operand.vmem [shape: f32[1,128], index: 1, kind: input, shape index: {}]   ;;  %s874_s2 = inlined_call_operand.vmem [shape: f32[1,128], index: 2, kind: input, shape index: {}]   ;;  %s875_s3 = inlined_call_operand.vmem [shape: bf16[128,128], index: 3, kind: input, shape index: {}]   ;;  %s876_s4 = inlined_call_operand.vmem [shape: bf16[128,128], index: 4, kind: input, shape index: {}]   ;;  %s877_s5 = inlined_call_operand.vmem [shape: f32[1,128], index: 5, kind: input, shape index: {}]   ;;  %s878_s6 = inlined_call_operand.vmem [shape: f32[1,128], index: 6, kind: input, shape index: {}]   ;;  %s879_s7 = inlined_call_operand.vmem [shape: f32[128,128], index: 7, kind: output, shape index: {}]  }
   0x1 LB: > { %s634_s25 = sadd.s32 4294967295, %s760_s24   ;;  %p638_p0 = scmp.ge.s32.totalorder %s760_s24, 1  ;;  %s760_s24 = sphi %s802_s24, %s17_s24  }
   0x2   : > { %p249_p1 = scmp.lt.s32.totalorder %s760_s24, 3 }
   0x4   : > { %p250_p2 = pnand %p638_p0, %p249_p1 }
   0x5   : > { %v742_v0 = vld [vmem:[%s876_s4] sm:$0xff] (!%p250_p2)   ;;  %s639_s28 = sshll.u32 (!%p250_p2), %s634_s25, 3  ;;  %v743_v1 = vld [vmem:[%s876_s4 + $0x8] sm:$0xff] (!%p250_p2)   ;;  %v744_v2 = vld [vmem:[%s876_s4 + $0x10] sm:$0xff] (!%p250_p2)  }
   0x6   : > { %253 = sbr.rel (%p250_p2) target bundleno = 262 (0x106), region = 48  ;;  %p287_p3 = scmp.lt.s32.totalorder (!%p250_p2), %s639_s28, 15  ;;  %694 = vmatprep.subr.bf16.mxu0 (!%p250_p2), %v742_v0  ;;  %718 = vmatprep.subr.bf16.mxu1 (!%p250_p2), %v742_v0  ;;  %v745_v3 = vld [vmem:[%s876_s4 + $0x18] sm:$0xff] (!%p250_p2)   ;;  %v746_v6 = vld [vmem:[%s876_s4 + $0x20] sm:$0xff] (!%p250_p2)   ;;  %v747_v7 = vld [vmem:[%s876_s4 + $0x28] sm:$0xff] (!%p250_p2)  }
   0x7   : > { %695 = vmatpush3.bf16.msra.mxu0 (!%p250_p2), %v742_v0  ;;  %726 = vmatpush3.bf16.msra.mxu1 (!%p250_p2), %v742_v0  ;;  %v748_v8 = vld [vmem:[%s876_s4 + $0x30] sm:$0xff] (!%p250_p2)   ;;  %v749_v9 = vld [vmem:[%s876_s4 + $0x38] sm:$0xff] (!%p250_p2)   ;;  %v645_v20 = vld [vmem:[%s873_s1] ss:$0 sm:$0xff] (!%p250_p2) }
   0x8   : > { %696 = vmatprep.subr.bf16.mxu0 (!%p250_p2), %v743_v1  ;;  %719 = vmatprep.subr.bf16.mxu1 (!%p250_p2), %v743_v1  ;;  %v646_v29 = vld [vmem:[%s874_s2] ss:$0 sm:$0xff] (!%p250_p2) }
   0x9   : > { %v659_v32 = vld [vmem:[%s877_s5] ss:$0 sm:$0xff] (!%p250_p2) }
   0xa   : > { %v660_v37 = vld [vmem:[%s878_s6] ss:$0 sm:$0xff] (!%p250_p2) }
   0xb   : > { %697 = vmatpush3.bf16.msra.mxu0 (!%p250_p2), %v743_v1  ;;  %727 = vmatpush3.bf16.msra.mxu1 (!%p250_p2), %v743_v1 }
   0xc   : > { %698 = vmatprep.subr.bf16.mxu0 (!%p250_p2), %v744_v2  ;;  %720 = vmatprep.subr.bf16.mxu1 (!%p250_p2), %v744_v2 }
   0xd   : > { %s881_s28 = smov (!%p287_p3, %s639_s28), 15 }
   0xe   : > { %s640_s10 = sshll.u32 %s881_s28, 2  ;;  %s644_s14 = sshll.u32 %s881_s28, 3 }
   0xf   : > { %s827_s13 = scalar_lea.vmem %s875_s3, %s640_s10  ;;  %699 = vmatpush3.bf16.msra.mxu0 %v744_v2  ;;  %728 = vmatpush3.bf16.msra.mxu1 %v744_v2  ;;  %s290_s27 = scalar_lea.vmem %s872_s0, %s640_s10 }
  0x10   : > { %v750_v4 = vld [vmem:[%s827_s13] sm:$0xff]   ;;  %v751_v5 = vld [vmem:[%s827_s13 + $0x10] sm:$0xff]   ;;  %700 = vmatprep.subr.bf16.mxu0 %v745_v3  ;;  %721 = vmatprep.subr.bf16.mxu1 %v745_v3  ;;  %v752_v10 = vld [vmem:[%s827_s13 + $0x8] sm:$0xff]   ;;  %s302_s17 = scalar_lea.vmem %s879_s7, %s644_s14 }
  0x11   : > { %710 = vmatprep.mubr.bf16.mxu0 %v750_v4  ;;  %714 = vmatprep.mubr.bf16.mxu1 %v751_v5  ;;  %v753_v11 = vld [vmem:[%s827_s13 + $0x18] sm:$0xff]   ;;  %v679_v12 = vld [vmem:[%s290_s27 + $0x8] sm:$0xff]   ;;  %v664_v14 = vld [vmem:[%s290_s27] sm:$0xff]  }
  0x12   : > { %v681_v13 = vld [vmem:[%s290_s27 + $0x18] sm:$0xff]   ;;  %v680_v15 = vld [vmem:[%s290_s27 + $0x10] sm:$0xff]   ;;  %v669_v16 = vunpack.c.l.bf16 %v679_v12  ;;  %v665_v18 = vunpack.c.l.bf16 %v664_v14  ;;  %v670_v21 = vunpack.c.h.bf16 %v679_v12  ;;  %v666_v23 = vunpack.c.h.bf16 %v664_v14 }
  0x13   : > { %701 = vmatpush3.bf16.msra.mxu0 %v745_v3  ;;  %729 = vmatpush3.bf16.msra.mxu1 %v745_v3  ;;  %v677_v17 = vunpack.c.l.bf16 %v681_v13  ;;  %v673_v19 = vunpack.c.l.bf16 %v680_v15  ;;  %v678_v22 = vunpack.c.h.bf16 %v681_v13  ;;  %v674_v24 = vunpack.c.h.bf16 %v680_v15 }
  0x14   : > { %702 = vmatprep.subr.bf16.mxu0 %v746_v6  ;;  %722 = vmatprep.subr.bf16.mxu1 %v746_v6  ;;  %v330_v25 = vmul.f32 %v669_v16, %v645_v20  ;;  %v328_v27 = vmul.f32 %v665_v18, %v645_v20  ;;  %v331_v30 = vmul.f32 %v670_v21, %v645_v20 }
  0x15   : > { %v334_v26 = vmul.f32 %v677_v17, %v645_v20  ;;  %v332_v28 = vmul.f32 %v673_v19, %v645_v20  ;;  %v335_v31 = vmul.f32 %v678_v22, %v645_v20  ;;  %v329_v33 = vmul.f32 %v666_v23, %v645_v20 }
  0x16   : > { %v333_v34 = vmul.f32 %v674_v24, %v645_v20  ;;  %v345_v35 = vadd.f32 %v646_v29, %v330_v25  ;;  %v343_v40 = vadd.f32 %v646_v29, %v328_v27  ;;  %v346_v46 = vadd.f32 %v646_v29, %v331_v30 }
  0x17   : > { %703 = vmatpush3.bf16.msra.mxu0 %v746_v6  ;;  %730 = vmatpush3.bf16.msra.mxu1 %v746_v6  ;;  %v349_v38 = vadd.f32 %v646_v29, %v334_v26  ;;  %v347_v41 = vadd.f32 %v646_v29, %v332_v28  ;;  %v350_v47 = vadd.f32 %v646_v29, %v335_v31 }
  0x18   : > { %704 = vmatprep.subr.bf16.mxu0 %v747_v7  ;;  %723 = vmatprep.subr.bf16.mxu1 %v747_v7  ;;  %v344_v52 = vadd.f32 %v646_v29, %v329_v33  ;;  %v348_v53 = vadd.f32 %v646_v29, %v333_v34 }
  0x1b   : > { %705 = vmatpush3.bf16.msra.mxu0 %v747_v7  ;;  %731 = vmatpush3.bf16.msra.mxu1 %v747_v7 }
  0x1c   : > { %706 = vmatprep.subr.bf16.mxu0 %v748_v8  ;;  %724 = vmatprep.subr.bf16.mxu1 %v748_v8 }
  0x1f   : > { %707 = vmatpush3.bf16.msra.mxu0 %v748_v8  ;;  %732 = vmatpush3.bf16.msra.mxu1 %v748_v8 }
  0x20   : > { %708 = vmatprep.subr.bf16.mxu0 %v749_v9  ;;  %725 = vmatprep.subr.bf16.mxu1 %v749_v9 }
  0x23   : > { %709 = vmatpush3.bf16.msra.mxu0 %v749_v9  ;;  %733 = vmatpush3.bf16.msra.mxu1 %v749_v9 }
  0x26   : > { %711 = vmatmul.mubr.bf16.vlgmr.msra.gmra.mrb[0].mxu0 %v752_v10  ;;  %715 = vmatmul.mubr.bf16.vlgmr.msra.gmra.mrb[0].mxu1 %v753_v11 }
  0xf9   : > { %v712_v36 = vpop.f32.mrb[0].mxu0  ;;  %v716_v39 = vpop.f32.mrb[0].mxu1 }
  0xfa   : > { %v521_v42 = vmul.f32 %v712_v36, %v659_v32  ;;  %v525_v43 = vmul.f32 %v716_v39, %v659_v32  ;;  %v481_v44 = vpop.f32.mrb[1].mxu0  ;;  %v497_v45 = vpop.f32.mrb[1].mxu1 }
  0xfb   : > { %v519_v48 = vmul.f32 %v659_v32, %v481_v44  ;;  %v523_v49 = vmul.f32 %v659_v32, %v497_v45  ;;  %v713_v50 = vpop.f32.mrb[2].mxu0  ;;  %v717_v51 = vpop.f32.mrb[2].mxu1 }
  0xfc   : > { %v536_v54 = vadd.f32 %v660_v37, %v521_v42  ;;  %v540_v55 = vadd.f32 %v660_v37, %v525_v43  ;;  %v522_v56 = vmul.f32 %v713_v50, %v659_v32  ;;  %v526_v57 = vmul.f32 %v717_v51, %v659_v32  ;;  %v484_v58 = vpop.f32.mrb[3].mxu0  ;;  %v500_v59 = vpop.f32.mrb[3].mxu1 }
  0xfd   : > { %v534_v60 = vadd.f32 %v660_v37, %v519_v48  ;;  %v538_v61 = vadd.f32 %v660_v37, %v523_v49  ;;  %v520_v62 = vmul.f32 %v659_v32, %v484_v58  ;;  %v524_v63 = vmul.f32 %v659_v32, %v500_v59 }
  0xfe   : > { %v544_v0 = vadd.f32 %v536_v54, %v345_v35  ;;  %v548_v1 = vadd.f32 %v540_v55, %v349_v38  ;;  %v537_v2 = vadd.f32 %v660_v37, %v522_v56  ;;  %v541_v3 = vadd.f32 %v660_v37, %v526_v57 }
  0xff   : > { %v542_v4 = vadd.f32 %v534_v60, %v343_v40  ;;  %v546_v5 = vadd.f32 %v538_v61, %v347_v41  ;;  %v535_v6 = vadd.f32 %v660_v37, %v520_v62  ;;  %v539_v7 = vadd.f32 %v660_v37, %v524_v63 }
 0x100   : > { %v552_v8 = vmax.f32 %v544_v0, 0.0  ;;  %v556_v9 = vmax.f32 %v548_v1, 0.0  ;;  %v545_v10 = vadd.f32 %v537_v2, %v346_v46  ;;  %v549_v11 = vadd.f32 %v541_v3, %v350_v47 }
 0x101   : > { %v550_v12 = vmax.f32 %v542_v4, 0.0  ;;  %v554_v13 = vmax.f32 %v546_v5, 0.0  ;;  %v543_v14 = vadd.f32 %v535_v6, %v344_v52  ;;  %v547_v15 = vadd.f32 %v539_v7, %v348_v53 }
 0x102   : > { %560 = vst [vmem:[%s302_s17 + $0x10] sm:$0xff] %v552_v8  ;;  %564 = vst [vmem:[%s302_s17 + $0x30] sm:$0xff] %v556_v9  ;;  %v553_v16 = vmax.f32 %v545_v10, 0.0  ;;  %v557_v17 = vmax.f32 %v549_v11, 0.0 }
 0x103   : > { %558 = vst [vmem:[%s302_s17] sm:$0xff] %v550_v12  ;;  %562 = vst [vmem:[%s302_s17 + $0x20] sm:$0xff] %v554_v13  ;;  %v551_v18 = vmax.f32 %v543_v14, 0.0  ;;  %v555_v19 = vmax.f32 %v547_v15, 0.0 }
 0x104   : > { %561 = vst [vmem:[%s302_s17 + $0x18] sm:$0xff] %v553_v16  ;;  %565 = vst [vmem:[%s302_s17 + $0x38] sm:$0xff] %v557_v17 }
 0x105   : > { %559 = vst [vmem:[%s302_s17 + $0x8] sm:$0xff] %v551_v18  ;;  %563 = vst [vmem:[%s302_s17 + $0x28] sm:$0xff] %v555_v19 }
 0x106 PF: > { %s17_s24 = sadd.s32 1, %s760_s24  }
 0x107   : > { %p14_p4 = scmp.ge.s32.totalorder %s17_s24, 4  }
 0x109   :  { %16 = sbr.rel (!%p14_p4) target bundleno = 1 (0x1), region = 81 }

// kernel: resblock_forward.6
= control target key start
LH: loop header
LB: loop body
LE: loop exit
PB: predicated region body
PF: predicated region fallthrough
CT: control target
= control target key end

     0   :  { %s1088_s21 = smov 0   ;;  %s1190_s0 = inlined_call_operand.vmem [shape: bf16[128,128], index: 0, kind: input, shape index: {}]   ;;  %s1191_s1 = inlined_call_operand.vmem [shape: bf16[128,128], index: 1, kind: input, shape index: {}]   ;;  %s1192_s2 = inlined_call_operand.vmem [shape: bf16[128,128], index: 2, kind: input, shape index: {}]   ;;  %s1193_s3 = inlined_call_operand.vmem [shape: bf16[128,128], index: 3, kind: input, shape index: {}]   ;;  %s1194_s4 = inlined_call_operand.vmem [shape: bf16[128,128], index: 4, kind: output, shape index: {0}]   ;;  %s1195_s5 = inlined_call_operand.vmem [shape: f32[2,2,128], index: 5, kind: output, shape index: {1}]   ;;  %s1196_s6 = inlined_call_operand.vmem [shape: f32[2,2,128], index: 6, kind: output, shape index: {2}]  }
   0x1 LB: > { %s1094_s22 = sadd.s32 4294967295, %s1051_s21   ;;  %p867_p0 = scmp.ge.s32.totalorder %s1051_s21, 1  ;;  %s1051_s21 = sphi %s1088_s21, %s17_s21  }
   0x2   : > { %p229_p1 = scmp.lt.s32.totalorder %s1051_s21, 3 }
   0x4   : > { %p230_p2 = pnand %p867_p0, %p229_p1 }
   0x5   : > { %v1021_v0 = vld [vmem:[%s1191_s1] sm:$0xff] (!%p230_p2)   ;;  %s868_s25 = sshll.u32 (!%p230_p2), %s1094_s22, 3  ;;  %v1023_v2 = vld [vmem:[%s1191_s1 + $0x8] sm:$0xff] (!%p230_p2)   ;;  %v1025_v4 = vld [vmem:[%s1191_s1 + $0x10] sm:$0xff] (!%p230_p2)   ;;  %p290_p4 = scmp.lt.s32.totalorder (!%p230_p2), %s1094_s22, 1 }
   0x6   : > { %233 = sbr.rel (%p230_p2) target bundleno = 283 (0x11b), region = 36  ;;  %v1022_v1 = vld [vmem:[%s1193_s3] sm:$0xff] (!%p230_p2)   ;;  %965 = vmatprep.subr.bf16.mxu0 (!%p230_p2), %v1021_v0  ;;  %p273_p3 = scmp.lt.s32.totalorder (!%p230_p2), %s868_s25, 15  ;;  %v1024_v3 = vld [vmem:[%s1193_s3 + $0x8] sm:$0xff] (!%p230_p2)   ;;  %v1026_v5 = vld [vmem:[%s1193_s3 + $0x10] sm:$0xff] (!%p230_p2)  }
   0x7   : > { %989 = vmatprep.subr.bf16.mxu1 (!%p230_p2), %v1022_v1  ;;  %966 = vmatpush3.bf16.msra.mxu0 (!%p230_p2), %v1021_v0  ;;  %v1027_v6 = vld [vmem:[%s1191_s1 + $0x18] sm:$0xff] (!%p230_p2)   ;;  %v1029_v8 = vld [vmem:[%s1191_s1 + $0x20] sm:$0xff] (!%p230_p2)   ;;  %v1031_v10 = vld [vmem:[%s1191_s1 + $0x28] sm:$0xff] (!%p230_p2)  }
   0x8   : > { %990 = vmatpush3.bf16.msra.mxu1 (!%p230_p2), %v1022_v1  ;;  %967 = vmatprep.subr.bf16.mxu0 (!%p230_p2), %v1023_v2  ;;  %v1028_v7 = vld [vmem:[%s1193_s3 + $0x18] sm:$0xff] (!%p230_p2)   ;;  %v1030_v9 = vld [vmem:[%s1193_s3 + $0x20] sm:$0xff] (!%p230_p2)   ;;  %v1032_v11 = vld [vmem:[%s1193_s3 + $0x28] sm:$0xff] (!%p230_p2)  }
   0x9   : > { %991 = vmatprep.subr.bf16.mxu1 (!%p230_p2), %v1024_v3  ;;  %v1033_v14 = vld [vmem:[%s1191_s1 + $0x30] sm:$0xff] (!%p230_p2)   ;;  %v1035_v16 = vld [vmem:[%s1191_s1 + $0x38] sm:$0xff] (!%p230_p2)  }
   0xa   : > { %v1034_v15 = vld [vmem:[%s1193_s3 + $0x30] sm:$0xff] (!%p230_p2)   ;;  %v1036_v17 = vld [vmem:[%s1193_s3 + $0x38] sm:$0xff] (!%p230_p2)  }
   0xb   : > { %968 = vmatpush3.bf16.msra.mxu0 (!%p230_p2), %v1023_v2 }
   0xc   : > { %992 = vmatpush3.bf16.msra.mxu1 (!%p230_p2), %v1024_v3  ;;  %969 = vmatprep.subr.bf16.mxu0 (!%p230_p2), %v1025_v4 }
   0xd   : > { %s1198_s25 = smov (!%p273_p3, %s868_s25), 15  ;;  %993 = vmatprep.subr.bf16.mxu1 %v1026_v5  ;;  %s1200_s22 = smov (!%p290_p4, %s1094_s22), 1 }
   0xe   : > { %s1123_s16 = sshll.u32 %s1198_s25, 2 }
   0xf   : > { %970 = vmatpush3.bf16.msra.mxu0 %v1025_v4  ;;  %s1135_s26 = scalar_lea.vmem %s1190_s0, %s1123_s16  ;;  %s1144_s30 = scalar_lea.vmem %s1192_s2, %s1123_s16 }
  0x10   : > { %994 = vmatpush3.bf16.msra.mxu1 %v1026_v5  ;;  %971 = vmatprep.subr.bf16.mxu0 %v1027_v6  ;;  %v1037_v12 = vld [vmem:[%s1135_s26] sm:$0xff]   ;;  %v1039_v18 = vld [vmem:[%s1135_s26 + $0x8] sm:$0xff]   ;;  %v1041_v20 = vld [vmem:[%s1135_s26 + $0x10] sm:$0xff]   ;;  %s1173_s20 = scalar_lea.vmem %s1194_s4, %s1123_s16  ;;  %s874_s16 = sshll.u32 %s1200_s22, 1 }
  0x11   : > { %995 = vmatprep.subr.bf16.mxu1 %v1028_v7  ;;  %v1038_v13 = vld [vmem:[%s1144_s30] sm:$0xff]   ;;  %981 = vmatprep.mubr.bf16.mxu0 %v1037_v12  ;;  %v1040_v19 = vld [vmem:[%s1144_s30 + $0x8] sm:$0xff]   ;;  %v1042_v21 = vld [vmem:[%s1144_s30 + $0x10] sm:$0xff]   ;;  %s297_s28 = scalar_lea.vmem %s1196_s6, %s874_s16 }
  0x12   : > { %1005 = vmatprep.mubr.bf16.mxu1 %v1038_v13  ;;  %v1043_v22 = vld [vmem:[%s1135_s26 + $0x18] sm:$0xff]   ;;  %s293_s26 = scalar_lea.vmem %s1195_s5, %s874_s16 }
  0x13   : > { %972 = vmatpush3.bf16.msra.mxu0 %v1027_v6  ;;  %v1044_v23 = vld [vmem:[%s1144_s30 + $0x18] sm:$0xff]  }
  0x14   : > { %996 = vmatpush3.bf16.msra.mxu1 %v1028_v7  ;;  %973 = vmatprep.subr.bf16.mxu0 %v1029_v8 }
  0x15   : > { %997 = vmatprep.subr.bf16.mxu1 %v1030_v9 }
  0x17   : > { %974 = vmatpush3.bf16.msra.mxu0 %v1029_v8 }
  0x18   : > { %998 = vmatpush3.bf16.msra.mxu1 %v1030_v9  ;;  %975 = vmatprep.subr.bf16.mxu0 %v1031_v10 }
  0x19   : > { %999 = vmatprep.subr.bf16.mxu1 %v1032_v11 }
  0x1b   : > { %976 = vmatpush3.bf16.msra.mxu0 %v1031_v10 }
  0x1c   : > { %1000 = vmatpush3.bf16.msra.mxu1 %v1032_v11  ;;  %977 = vmatprep.subr.bf16.mxu0 %v1033_v14 }
  0x1d   : > { %1001 = vmatprep.subr.bf16.mxu1 %v1034_v15 }
  0x1f   : > { %978 = vmatpush3.bf16.msra.mxu0 %v1033_v14 }
  0x20   : > { %1002 = vmatpush3.bf16.msra.mxu1 %v1034_v15  ;;  %979 = vmatprep.subr.bf16.mxu0 %v1035_v16 }
  0x21   : > { %1003 = vmatprep.subr.bf16.mxu1 %v1036_v17 }
  0x23   : > { %980 = vmatpush3.bf16.msra.mxu0 %v1035_v16 }
  0x24   : > { %1004 = vmatpush3.bf16.msra.mxu1 %v1036_v17 }
  0x26   : > { %982 = vmatmul.mubr.bf16.vlgmr.msra.gmra.mrb[0].mxu0 %v1039_v18 }
  0x27   : > { %1006 = vmatmul.mubr.bf16.vlgmr.msra.gmra.mrb[0].mxu1 %v1040_v19  ;;  %985 = vmatprep.mubr.bf16.mxu0 %v1041_v20 }
  0x28   : > { %1009 = vmatprep.mubr.bf16.mxu1 %v1042_v21 }
  0x2e   : > { %986 = vmatmul.mubr.bf16.gmra.mrb[4].mxu0 %v1043_v22 }
  0x2f   : > { %1010 = vmatmul.mubr.bf16.gmra.mrb[4].mxu1 %v1044_v23 }
  0xf9   : > { %v983_v24 = vpop.f32.mrb[0].mxu0 }
  0xfa   : > { %v1007_v25 = vpop.f32.mrb[0].mxu1  ;;  %v429_v26 = vpop.f32.mrb[1].mxu0  ;;  %v516_v40 = vmul.f32 %v983_v24, %v983_v24 }
  0xfb   : > { %v666_v27 = vpop.f32.mrb[1].mxu1  ;;  %v984_v28 = vpop.f32.mrb[2].mxu0  ;;  %v514_v32 = vmul.f32 %v429_v26, %v429_v26  ;;  %v713_v43 = vmul.f32 %v1007_v25, %v1007_v25 }
  0xfc   : > { %v926_v29 = vpack.c.bf16 %v984_v28, %v983_v24  ;;  %v1008_v30 = vpop.f32.mrb[2].mxu1  ;;  %v432_v31 = vpop.f32.mrb[3].mxu0  ;;  %v711_v37 = vmul.f32 %v666_v27, %v666_v27  ;;  %v517_v46 = vmul.f32 %v984_v28, %v984_v28 }
  0xfd   : > { %v921_v33 = vpack.c.bf16 %v432_v31, %v429_v26  ;;  %v500_v34 = vadd.f32 %v432_v31, %v429_v26  ;;  %v515_v35 = vmul.f32 %v432_v31, %v432_v31  ;;  %v669_v36 = vpop.f32.mrb[3].mxu1  ;;  %v714_v50 = vmul.f32 %v1008_v30, %v1008_v30 }
  0xfe   : > { %938 = vst [vmem:[%s1173_s20 + $0x8] sm:$0xff] %v926_v29   ;;  %v697_v38 = vadd.f32 %v669_v36, %v666_v27  ;;  %v712_v39 = vmul.f32 %v669_v36, %v669_v36 }
  0xff   : > { %922 = vst [vmem:[%s1173_s20] sm:$0xff] %v921_v33   ;;  %v501_v41 = vadd.f32 %v983_v24, %v500_v34  ;;  %v522_v42 = vadd.f32 %v515_v35, %v514_v32 }
 0x100   : > { %v698_v44 = vadd.f32 %v1007_v25, %v697_v38  ;;  %v719_v45 = vadd.f32 %v712_v39, %v711_v37 }
 0x101   : > { %v523_v47 = vadd.f32 %v522_v42, %v516_v40  ;;  %v987_v48 = vpop.f32.mrb[4].mxu0  ;;  %v502_v49 = vadd.f32 %v984_v28, %v501_v41 }
 0x102   : > { %v720_v51 = vadd.f32 %v719_v45, %v713_v43  ;;  %v1011_v52 = vpop.f32.mrb[4].mxu1  ;;  %v445_v53 = vpop.f32.mrb[5].mxu0  ;;  %v699_v54 = vadd.f32 %v1008_v30, %v698_v44  ;;  %v520_v10 = vmul.f32 %v987_v48, %v987_v48 }
 0x103   : > { %v503_v55 = vadd.f32 %v502_v49, %v445_v53  ;;  %v518_v56 = vmul.f32 %v445_v53, %v445_v53  ;;  %v524_v57 = vadd.f32 %v523_v47, %v517_v46  ;;  %v682_v58 = vpop.f32.mrb[5].mxu1  ;;  %v988_v59 = vpop.f32.mrb[6].mxu0  ;;  %v717_v14 = vmul.f32 %v1011_v52, %v1011_v52 }
 0x104   : > { %v700_v60 = vadd.f32 %v699_v54, %v682_v58  ;;  %v715_v61 = vmul.f32 %v682_v58, %v682_v58  ;;  %v721_v62 = vadd.f32 %v720_v51, %v714_v50  ;;  %v936_v63 = vpack.c.bf16 %v988_v59, %v987_v48  ;;  %v1012_v0 = vpop.f32.mrb[6].mxu1  ;;  %v448_v1 = vpop.f32.mrb[7].mxu0 }
 0x105   : > { %v525_v2 = vadd.f32 %v524_v57, %v518_v56  ;;  %v931_v3 = vpack.c.bf16 %v448_v1, %v445_v53  ;;  %v685_v4 = vpop.f32.mrb[7].mxu1  ;;  %v504_v6 = vadd.f32 %v503_v55, %v448_v1  ;;  %v519_v7 = vmul.f32 %v448_v1, %v448_v1 }
 0x106   : > { %v722_v5 = vadd.f32 %v721_v62, %v715_v61  ;;  %940 = vst [vmem:[%s1173_s20 + $0x18] sm:$0xff] %v936_v63   ;;  %v701_v8 = vadd.f32 %v700_v60, %v685_v4  ;;  %v716_v9 = vmul.f32 %v685_v4, %v685_v4  ;;  %v521_v16 = vmul.f32 %v988_v59, %v988_v59 }
 0x107   : > { %939 = vst [vmem:[%s1173_s20 + $0x10] sm:$0xff] %v931_v3   ;;  %v505_v11 = vadd.f32 %v987_v48, %v504_v6  ;;  %v526_v12 = vadd.f32 %v525_v2, %v519_v7  ;;  %v718_v20 = vmul.f32 %v1012_v0, %v1012_v0 }
 0x108   : > { %v702_v13 = vadd.f32 %v1011_v52, %v701_v8  ;;  %v723_v15 = vadd.f32 %v722_v5, %v716_v9 }
 0x109   : > { %v506_v17 = vadd.f32 %v988_v59, %v505_v11  ;;  %v527_v18 = vadd.f32 %v526_v12, %v520_v10 }
 0x10a   : > { %v703_v19 = vadd.f32 %v1012_v0, %v702_v13  ;;  %v724_v21 = vadd.f32 %v723_v15, %v717_v14 }
 0x10b   : > { %v507_v22 = vrot.slane %v506_v17, 4  ;;  %v528_v23 = vadd.f32 %v527_v18, %v521_v16 }
 0x10c   : > { %v704_v24 = vrot.slane %v703_v19, 4  ;;  %v725_v25 = vadd.f32 %v724_v21, %v718_v20 }
 0x10d   : > { %v508_v26 = vadd.f32 %v507_v22, %v506_v17  ;;  %v529_v27 = vrot.slane %v528_v23, 4 }
 0x10e   : > { %v705_v28 = vadd.f32 %v704_v24, %v703_v19  ;;  %v726_v29 = vrot.slane %v725_v25, 4 }
 0x10f   : > { %v509_v30 = vrot.slane %v508_v26, 2  ;;  %v530_v31 = vadd.f32 %v529_v27, %v528_v23 }
 0x110   : > { %v706_v32 = vrot.slane %v705_v28, 2  ;;  %v727_v33 = vadd.f32 %v726_v29, %v725_v25 }
 0x111   : > { %v510_v34 = vadd.f32 %v509_v30, %v508_v26  ;;  %v531_v35 = vrot.slane %v530_v31, 2 }
 0x112   : > { %v707_v36 = vadd.f32 %v706_v32, %v705_v28  ;;  %v728_v37 = vrot.slane %v727_v33, 2 }
 0x113   : > { %v511_v38 = vrot.slane %v510_v34, 1  ;;  %v532_v39 = vadd.f32 %v531_v35, %v530_v31 }
 0x114   : > { %v708_v40 = vrot.slane %v707_v36, 1  ;;  %v729_v41 = vadd.f32 %v728_v37, %v727_v33 }
 0x115   : > { %v512_v42 = vadd.f32 %v511_v38, %v510_v34  ;;  %v533_v43 = vrot.slane %v532_v39, 1 }
 0x116   : > { %v709_v44 = vadd.f32 %v708_v40, %v707_v36  ;;  %v730_v45 = vrot.slane %v729_v41, 1 }
 0x117   : > { %513 = vst [vmem:[%s293_s26] sm:$0x1] %v512_v42  ;;  %v534_v46 = vadd.f32 %v533_v43, %v532_v39 }
 0x118   : > { %710 = vst [vmem:[%s297_s28] sm:$0x1] %v709_v44  ;;  %v731_v47 = vadd.f32 %v730_v45, %v729_v41 }
 0x119   : > { %535 = vst [vmem:[%s293_s26 + $0x1] sm:$0x1] %v534_v46 }
 0x11a   : > { %732 = vst [vmem:[%s297_s28 + $0x1] sm:$0x1] %v731_v47 }
 0x11b PF: > { %s17_s21 = sadd.s32 1, %s1051_s21  }
 0x11c   : > { %p14_p5 = scmp.ge.s32.totalorder %s17_s21, 4  }
 0x11e   :  { %16 = sbr.rel (!%p14_p5) target bundleno = 1 (0x1), region = 93 }

</bundles_post_ra>
